<compile_context>
chip_gen: v5e
topology: v5e:2x2
jax: 0.10.0
libtpu: 0.0.40
codegen_flags: <defaults>
</compile_context>

<pallas_src>
import functools
import math

import jax
import jax.numpy as jnp
from jax.experimental import pallas as pl
from jax.experimental.pallas import tpu as pltpu

_NEG_BIG = -1e30  # finite "-inf" keeps fully-masked rows NaN-free in online softmax


def _layernorm(h, w, b, eps=1e-5):
    mu = jnp.mean(h, axis=-1, keepdims=True)
    var = jnp.mean((h - mu) ** 2, axis=-1, keepdims=True)
    return (h - mu) * jax.lax.rsqrt(var + eps) * w + b


def _gelu(x):
    # TODO(synk): PyTorch nn.GELU() default is the exact erf form; using the tanh
    # approximation (GPT-2 "gelu_new") for robust TPU lowering.
    c = math.sqrt(2.0 / math.pi)
    return 0.5 * x * (1.0 + jnp.tanh(c * (x + 0.044715 * x * x * x)))


# --------------------------------------------------------------------------- #
# Kernel 1: LayerNorm-1 + fused QKV projection, head-major q/k/v output.
# --------------------------------------------------------------------------- #
def _qkv_kernel(x_ref, ln1w_ref, ln1b_ref, wqkv_ref, bqkv_ref,
                q_ref, k_ref, v_ref, *, n_head, compute_dtype):
    x = x_ref[0].astype(jnp.float32)                        # (tt, C)
    C = x.shape[-1]
    hd = C // n_head

    h = _layernorm(x, ln1w_ref[0], ln1b_ref[0])
    qkv = jnp.dot(h.astype(compute_dtype), wqkv_ref[...],
                  preferred_element_type=jnp.float32) + bqkv_ref[0]   # (tt, 3C)

    # Write q/k/v head-major with static lane slices (no transpose / concat).
    for hh in range(n_head):
        base = hh * hd
        q_ref[0, hh, :, :] = qkv[:, base:base + hd].astype(q_ref.dtype)
        k_ref[0, hh, :, :] = qkv[:, C + base:C + base + hd].astype(k_ref.dtype)
        v_ref[0, hh, :, :] = qkv[:, 2 * C + base:2 * C + base + hd].astype(v_ref.dtype)


# --------------------------------------------------------------------------- #
# Kernel 2: flash-style causal attention + out-proj + LN2 + MLP, fused.
# --------------------------------------------------------------------------- #
def _attn_mlp_kernel(x_ref, q_ref, k_ref, v_ref,
                     wao_ref, bao_ref, ln2w_ref, ln2b_ref,
                     wfc_ref, bfc_ref, wmp_ref, bmp_ref,
                     o_ref, m_sc, l_sc, acc_sc,
                     *, n_head, tq, tkv, compute_dtype):
    qi = pl.program_id(1)
    ki = pl.program_id(2)
    nk = pl.num_programs(2)
    hd = q_ref.shape[-1]
    scale = 1.0 / math.sqrt(hd)

    @pl.when(ki == 0)
    def _init():
        m_sc[...] = jnp.full(m_sc.shape, _NEG_BIG, jnp.float32)
        l_sc[...] = jnp.zeros(l_sc.shape, jnp.float32)
        acc_sc[...] = jnp.zeros(acc_sc.shape, jnp.float32)

    # Skip kv tiles that lie entirely above the causal diagonal.
    @pl.when(ki * tkv <= qi * tq + (tq - 1))
    def _compute():
        q = q_ref[0]                                        # (n_head, tq, hd)
        k = k_ref[0]                                        # (n_head, tkv, hd)
        s = jnp.einsum("hqd,hkd->hqk", q, k,
                       preferred_element_type=jnp.float32) * scale

        row = qi * tq + jax.lax.broadcasted_iota(jnp.int32, (tq, tkv), 0)
        col = ki * tkv + jax.lax.broadcasted_iota(jnp.int32, (tq, tkv), 1)
        mask = (col <= row)[None, :, :]                     # (1, tq, tkv)

        s = jnp.where(mask, s, _NEG_BIG)
        m_prev = m_sc[...]                                  # (n_head, tq, 1)
        m_new = jnp.maximum(m_prev, jnp.max(s, axis=-1, keepdims=True))
        alpha = jnp.exp(m_prev - m_new)
        p = jnp.where(mask, jnp.exp(s - m_new), 0.0)

        l_sc[...] = alpha * l_sc[...] + jnp.sum(p, axis=-1, keepdims=True)
        acc_sc[...] = alpha * acc_sc[...] + jnp.einsum(
            "hqk,hkd->hqd", p.astype(compute_dtype), v_ref[0],
            preferred_element_type=jnp.float32)
        m_sc[...] = m_new

    @pl.when(ki == nk - 1)
    def _finalize():
        # Heads stay batched; merge them through the (head-major) output proj.
        y = acc_sc[...] * pl.reciprocal(l_sc[...], approx=True)   # (nh, tq, hd)
        partial = jnp.einsum("hqd,hdc->hqc", y.astype(compute_dtype),
                             wao_ref[...], preferred_element_type=jnp.float32)
        attn = jnp.sum(partial, axis=0) + bao_ref[0]              # (tq, C)

        x1 = x_ref[0].astype(jnp.float32) + attn                  # residual 1

        h2 = _layernorm(x1, ln2w_ref[0], ln2b_ref[0])
        fc = jnp.dot(h2.astype(compute_dtype), wfc_ref[...],
                     preferred_element_type=jnp.float32) + bfc_ref[0]
        mlp = jnp.dot(_gelu(fc).astype(compute_dtype), wmp_ref[...],
                      preferred_element_type=jnp.float32) + bmp_ref[0]

        o_ref[0] = (x1 + mlp).astype(o_ref.dtype)                 # residual 2


# --------------------------------------------------------------------------- #
# Wrapper
# --------------------------------------------------------------------------- #
def _full_spec(arr):
    nd = arr.ndim
    return pl.BlockSpec(arr.shape, lambda *_, _nd=nd: (0,) * _nd)


def gpt2_block(x, params, n_head, *, compute_dtype=None,
               tile_q=128, tile_kv=128, vmem_limit_bytes=48 * 1024 * 1024):
    (ln1w, ln1b, wqkv, bqkv, wao, bao,
     ln2w, ln2b, wfc, bfc, wmp, bmp) = params
    B, T, C = x.shape
    assert C % n_head == 0
    hd = C // n_head
    cdt = jnp.dtype(x.dtype if compute_dtype is None else compute_dtype)

    tq = min(tile_q, T)
    tkv = min(tile_kv, T)
    assert T % tq == 0 and T % tkv == 0

    # Matmul weights pre-cast to the compute dtype (halves weight DMA/VMEM in
    # bf16 mode).  w_ao is reshaped head-major so the attention kernel needs no
    # in-kernel head transpose/concat.  Biases / LN params stay f32.
    wqkv_c = wqkv.astype(cdt)
    wao_c = wao.reshape(n_head, hd, C).astype(cdt)
    wfc_c = wfc.astype(cdt)
    wmp_c = wmp.astype(cdt)

    # ---- kernel 1: LN1 + QKV projection ------------------------------------ #
    qkv_struct = jax.ShapeDtypeStruct((B, n_head, T, hd), cdt)
    q, k, v = pl.pallas_call(
        functools.partial(_qkv_kernel, n_head=n_head, compute_dtype=cdt),
        out_shape=(qkv_struct, qkv_struct, qkv_struct),
        grid_spec=pltpu.PrefetchScalarGridSpec(
            num_scalar_prefetch=0,
            grid=(B, T // tq),
            in_specs=[pl.BlockSpec((1, tq, C), lambda b, t: (b, t, 0)),
                      _full_spec(ln1w), _full_spec(ln1b),
                      _full_spec(wqkv_c), _full_spec(bqkv)],
            out_specs=[pl.BlockSpec((1, n_head, tq, hd),
                                    lambda b, t: (b, 0, t, 0))] * 3,
        ),
        compiler_params=pltpu.CompilerParams(
            dimension_semantics=("parallel", "parallel"),
            vmem_limit_bytes=vmem_limit_bytes),
    )(x, ln1w, ln1b, wqkv_c, bqkv)

    # ---- kernel 2: flash attention + out-proj + LN2 + MLP ------------------ #
    kernel = functools.partial(_attn_mlp_kernel, n_head=n_head,
                               tq=tq, tkv=tkv, compute_dtype=cdt)
    return pl.pallas_call(
        kernel,
        out_shape=jax.ShapeDtypeStruct((B, T, C), x.dtype),
        grid_spec=pltpu.PrefetchScalarGridSpec(
            num_scalar_prefetch=0,
            grid=(B, T // tq, T // tkv),
            in_specs=[
                pl.BlockSpec((1, tq, C), lambda b, qi, ki: (b, qi, 0)),
                pl.BlockSpec((1, n_head, tq, hd), lambda b, qi, ki: (b, 0, qi, 0)),
                pl.BlockSpec((1, n_head, tkv, hd), lambda b, qi, ki: (b, 0, ki, 0)),
                pl.BlockSpec((1, n_head, tkv, hd), lambda b, qi, ki: (b, 0, ki, 0)),
                _full_spec(wao_c), _full_spec(bao),
                _full_spec(ln2w), _full_spec(ln2b),
                _full_spec(wfc_c), _full_spec(bfc),
                _full_spec(wmp_c), _full_spec(bmp),
            ],
            out_specs=pl.BlockSpec((1, tq, C), lambda b, qi, ki: (b, qi, 0)),
            scratch_shapes=[pltpu.VMEM((n_head, tq, 1), jnp.float32),
                            pltpu.VMEM((n_head, tq, 1), jnp.float32),
                            pltpu.VMEM((n_head, tq, hd), jnp.float32)],
        ),
        compiler_params=pltpu.CompilerParams(
            dimension_semantics=("parallel", "parallel", "arbitrary"),
            vmem_limit_bytes=vmem_limit_bytes),
    )(x, q, k, v, wao_c, bao, ln2w, ln2b, wfc_c, bfc, wmp_c, bmp)


# --------------------------------------------------------------------------- #
# Pure-JAX reference
# --------------------------------------------------------------------------- #
def _reference(x, params, n_head):
    (ln1w, ln1b, wqkv, bqkv, wao, bao, ln2w, ln2b, wfc, bfc, wmp, bmp) = params
    B, T, C = x.shape
    hd = C // n_head
    h = _layernorm(x, ln1w[0], ln1b[0])
    qkv = h @ wqkv + bqkv[0]
    q, k, v = jnp.split(qkv, 3, axis=-1)

    def heads(a):  # (B,T,C) -> (B,nh,T,hd)
        return a.reshape(B, T, n_head, hd).transpose(0, 2, 1, 3)

    q, k, v = heads(q), heads(k), heads(v)
    att = jnp.einsum("bhtd,bhsd->bhts", q, k) / math.sqrt(hd)
    mask = jnp.tril(jnp.ones((T, T), dtype=bool))
    att = jnp.where(mask, att, -jnp.inf)
    p = jax.nn.softmax(att, axis=-1)
    y = jnp.einsum("bhts,bhsd->bhtd", p, v).transpose(0, 2, 1, 3).reshape(B, T, C)
    x1 = x + y @ wao + bao[0]
    h2 = _layernorm(x1, ln2w[0], ln2b[0])
    return x1 + _gelu(h2 @ wfc + bfc[0]) @ wmp + bmp[0]


if __name__ == "__main__":
    B, T, C, n_head = 2, 8, 32, 4

    key = jax.random.PRNGKey(0)
    ks = jax.random.split(key, 10)
    std = 0.02

    ln1_w = jnp.ones((1, C), jnp.float32)
    ln1_b = jnp.zeros((1, C), jnp.float32)
    w_qkv = std * jax.random.normal(ks[0], (C, 3 * C), jnp.float32)
    b_qkv = std * jax.random.normal(ks[5], (1, 3 * C), jnp.float32)
    w_ao = std * jax.random.normal(ks[1], (C, C), jnp.float32)
    b_ao = std * jax.random.normal(ks[6], (1, C), jnp.float32)
    ln2_w = jnp.ones((1, C), jnp.float32)
    ln2_b = jnp.zeros((1, C), jnp.float32)
    w_fc = std * jax.random.normal(ks[2], (C, 4 * C), jnp.float32)
    b_fc = std * jax.random.normal(ks[7], (1, 4 * C), jnp.float32)
    w_mp = std * jax.random.normal(ks[3], (4 * C, C), jnp.float32)
    b_mp = std * jax.random.normal(ks[8], (1, C), jnp.float32)

    params = (ln1_w, ln1_b, w_qkv, b_qkv, w_ao, b_ao,
              ln2_w, ln2_b, w_fc, b_fc, w_mp, b_mp)

    x = jax.random.normal(ks[4], (B, T, C), jnp.float32)
    ref = _reference(x, params, n_head)

    # f32 compute path (tight check).
    out_f32 = jax.block_until_ready(gpt2_block(x, params, n_head))
    assert out_f32.shape == (B, T, C)
    assert jnp.allclose(out_f32, ref, atol=1e-3, rtol=1e-3), "f32 mismatch vs reference"

    # bf16 matmul operands with f32 accumulation / LN / softmax / residuals (loose check).
    out_bf16 = jax.block_until_ready(
        gpt2_block(x, params, n_head, compute_dtype=jnp.bfloat16))
    assert out_bf16.dtype == x.dtype
    assert jnp.allclose(out_bf16, ref, atol=3e-2, rtol=3e-2), "bf16 mismatch vs reference"

    print("KERNEL_OK")
</pallas_src>

<mosaic_0001>
module attributes {stable_mosaic.version = 11 : i64} {
  func.func @_qkv_kernel(%arg0: i32, %arg1: i32, %arg2: memref<1x8x32xf32, #tpu.memory_space<vmem>>, %arg3: memref<1x32xf32, #tpu.memory_space<vmem>>, %arg4: memref<1x32xf32, #tpu.memory_space<vmem>>, %arg5: memref<32x96xf32, #tpu.memory_space<vmem>>, %arg6: memref<1x96xf32, #tpu.memory_space<vmem>>, %arg7: memref<1x4x8x8xf32, #tpu.memory_space<vmem>>, %arg8: memref<1x4x8x8xf32, #tpu.memory_space<vmem>>, %arg9: memref<1x4x8x8xf32, #tpu.memory_space<vmem>>) attributes {dimension_semantics = [#tpu.dimension_semantics<parallel>, #tpu.dimension_semantics<parallel>], iteration_bounds = array<i64: 2, 1>, scalar_prefetch = 0 : i64, scratch_operands = 0 : i64, tpu.core_type = #tpu.core_type<tc>, window_params = [{transform_indices = @transform_0, window_bounds = array<i64: 1, 8, 32>}, {pipeline_mode = #tpu.pipeline_mode<synchronous>, transform_indices = @transform_1, window_bounds = array<i64: 1, 32>}, {pipeline_mode = #tpu.pipeline_mode<synchronous>, transform_indices = @transform_2, window_bounds = array<i64: 1, 32>}, {pipeline_mode = #tpu.pipeline_mode<synchronous>, transform_indices = @transform_3, window_bounds = array<i64: 32, 96>}, {pipeline_mode = #tpu.pipeline_mode<synchronous>, transform_indices = @transform_4, window_bounds = array<i64: 1, 96>}, {transform_indices = @transform_5, window_bounds = array<i64: 1, 4, 8, 8>}, {transform_indices = @transform_6, window_bounds = array<i64: 1, 4, 8, 8>}, {transform_indices = @transform_7, window_bounds = array<i64: 1, 4, 8, 8>}]} {
    %c0 = arith.constant 0 : index
    %c0_0 = arith.constant 0 : index
    %c0_1 = arith.constant 0 : index
    %0 = vector.load %arg2[%c0, %c0_0, %c0_1] : memref<1x8x32xf32, #tpu.memory_space<vmem>>, vector<1x8x32xf32>
    %1 = vector.shape_cast %0 : vector<1x8x32xf32> to vector<8x32xf32>
    %c0_2 = arith.constant 0 : index
    %c0_3 = arith.constant 0 : index
    %2 = vector.load %arg3[%c0_2, %c0_3] : memref<1x32xf32, #tpu.memory_space<vmem>>, vector<1x32xf32>
    %3 = vector.shape_cast %2 : vector<1x32xf32> to vector<32xf32>
    %c0_4 = arith.constant 0 : index
    %c0_5 = arith.constant 0 : index
    %4 = vector.load %arg4[%c0_4, %c0_5] : memref<1x32xf32, #tpu.memory_space<vmem>>, vector<1x32xf32>
    %5 = vector.shape_cast %4 : vector<1x32xf32> to vector<32xf32>
    %cst = arith.constant dense<0.000000e+00> : vector<8xf32>
    %6 = vector.multi_reduction <add>, %1, %cst [1] : vector<8x32xf32> to vector<8xf32>
    %7 = vector.shape_cast %6 : vector<8xf32> to vector<8x1xf32>
    %cst_6 = arith.constant 3.200000e+01 : f32
    %8 = vector.broadcast %cst_6 : f32 to vector<8x1xf32>
    %9 = arith.divf %7, %8 : vector<8x1xf32>
    %10 = vector.broadcast %9 : vector<8x1xf32> to vector<8x32xf32>
    %11 = arith.subf %1, %10 : vector<8x32xf32>
    %12 = arith.mulf %11, %11 : vector<8x32xf32>
    %cst_7 = arith.constant dense<0.000000e+00> : vector<8xf32>
    %13 = vector.multi_reduction <add>, %12, %cst_7 [1] : vector<8x32xf32> to vector<8xf32>
    %14 = vector.shape_cast %13 : vector<8xf32> to vector<8x1xf32>
    %cst_8 = arith.constant 3.200000e+01 : f32
    %15 = vector.broadcast %cst_8 : f32 to vector<8x1xf32>
    %16 = arith.divf %14, %15 : vector<8x1xf32>
    %17 = vector.broadcast %9 : vector<8x1xf32> to vector<8x32xf32>
    %18 = arith.subf %1, %17 : vector<8x32xf32>
    %cst_9 = arith.constant 9.99999974E-6 : f32
    %19 = vector.broadcast %cst_9 : f32 to vector<8x1xf32>
    %20 = arith.addf %16, %19 : vector<8x1xf32>
    %21 = math.rsqrt %20 : vector<8x1xf32>
    %22 = vector.broadcast %21 : vector<8x1xf32> to vector<8x32xf32>
    %23 = arith.mulf %18, %22 : vector<8x32xf32>
    %24 = vector.shape_cast %3 : vector<32xf32> to vector<1x32xf32>
    %25 = vector.broadcast %24 : vector<1x32xf32> to vector<8x32xf32>
    %26 = arith.mulf %23, %25 : vector<8x32xf32>
    %27 = vector.shape_cast %5 : vector<32xf32> to vector<1x32xf32>
    %28 = vector.broadcast %27 : vector<1x32xf32> to vector<8x32xf32>
    %29 = arith.addf %26, %28 : vector<8x32xf32>
    %c0_10 = arith.constant 0 : index
    %c0_11 = arith.constant 0 : index
    %30 = vector.load %arg5[%c0_10, %c0_11] : memref<32x96xf32, #tpu.memory_space<vmem>>, vector<32x96xf32>
    %cst_12 = arith.constant dense<0.000000e+00> : vector<8x96xf32>
    %31 = tpu.matmul %29, %30, %cst_12 {dimension_numbers = #tpu.dot_dimension_numbers<[1], [0], [0], [1], [0, 0, 1, 1], [], []>} : vector<8x32xf32>, vector<32x96xf32>, vector<8x96xf32> -> vector<8x96xf32>
    %c0_13 = arith.constant 0 : index
    %c0_14 = arith.constant 0 : index
    %32 = vector.load %arg6[%c0_13, %c0_14] : memref<1x96xf32, #tpu.memory_space<vmem>>, vector<1x96xf32>
    %33 = vector.shape_cast %32 : vector<1x96xf32> to vector<96xf32>
    %34 = vector.shape_cast %33 : vector<96xf32> to vector<1x96xf32>
    %35 = vector.broadcast %34 : vector<1x96xf32> to vector<8x96xf32>
    %36 = arith.addf %31, %35 : vector<8x96xf32>
    %37 = vector.extract_strided_slice %36 {offsets = [0, 0], sizes = [8, 8], strides = [1, 1]} : vector<8x96xf32> to vector<8x8xf32>
    %c0_15 = arith.constant 0 : index
    %c0_16 = arith.constant 0 : index
    %c0_17 = arith.constant 0 : index
    %c0_18 = arith.constant 0 : index
    %38 = vector.load %arg7[%c0_15, %c0_16, %c0_17, %c0_18] : memref<1x4x8x8xf32, #tpu.memory_space<vmem>>, vector<1x1x8x8xf32>
    %39 = vector.shape_cast %38 : vector<1x1x8x8xf32> to vector<8x8xf32>
    %40 = vector.shape_cast %37 : vector<8x8xf32> to vector<1x1x8x8xf32>
    tpu.vector_store %arg7[%c0_15, %c0_16, %c0_17, %c0_18], %40 {strides = array<i32>} : memref<1x4x8x8xf32, #tpu.memory_space<vmem>>, vector<1x1x8x8xf32>,
    %41 = vector.extract_strided_slice %36 {offsets = [0, 32], sizes = [8, 8], strides = [1, 1]} : vector<8x96xf32> to vector<8x8xf32>
    %c0_19 = arith.constant 0 : index
    %c0_20 = arith.constant 0 : index
    %c0_21 = arith.constant 0 : index
    %c0_22 = arith.constant 0 : index
    %42 = vector.load %arg8[%c0_19, %c0_20, %c0_21, %c0_22] : memref<1x4x8x8xf32, #tpu.memory_space<vmem>>, vector<1x1x8x8xf32>
    %43 = vector.shape_cast %42 : vector<1x1x8x8xf32> to vector<8x8xf32>
    %44 = vector.shape_cast %41 : vector<8x8xf32> to vector<1x1x8x8xf32>
    tpu.vector_store %arg8[%c0_19, %c0_20, %c0_21, %c0_22], %44 {strides = array<i32>} : memref<1x4x8x8xf32, #tpu.memory_space<vmem>>, vector<1x1x8x8xf32>,
    %45 = vector.extract_strided_slice %36 {offsets = [0, 64], sizes = [8, 8], strides = [1, 1]} : vector<8x96xf32> to vector<8x8xf32>
    %c0_23 = arith.constant 0 : index
    %c0_24 = arith.constant 0 : index
    %c0_25 = arith.constant 0 : index
    %c0_26 = arith.constant 0 : index
    %46 = vector.load %arg9[%c0_23, %c0_24, %c0_25, %c0_26] : memref<1x4x8x8xf32, #tpu.memory_space<vmem>>, vector<1x1x8x8xf32>
    %47 = vector.shape_cast %46 : vector<1x1x8x8xf32> to vector<8x8xf32>
    %48 = vector.shape_cast %45 : vector<8x8xf32> to vector<1x1x8x8xf32>
    tpu.vector_store %arg9[%c0_23, %c0_24, %c0_25, %c0_26], %48 {strides = array<i32>} : memref<1x4x8x8xf32, #tpu.memory_space<vmem>>, vector<1x1x8x8xf32>,
    %49 = vector.extract_strided_slice %36 {offsets = [0, 8], sizes = [8, 8], strides = [1, 1]} : vector<8x96xf32> to vector<8x8xf32>
    %c0_27 = arith.constant 0 : index
    %c1 = arith.constant 1 : index
    %c0_28 = arith.constant 0 : index
    %c0_29 = arith.constant 0 : index
    %50 = vector.load %arg7[%c0_27, %c1, %c0_28, %c0_29] : memref<1x4x8x8xf32, #tpu.memory_space<vmem>>, vector<1x1x8x8xf32>
    %51 = vector.shape_cast %50 : vector<1x1x8x8xf32> to vector<8x8xf32>
    %52 = vector.shape_cast %49 : vector<8x8xf32> to vector<1x1x8x8xf32>
    tpu.vector_store %arg7[%c0_27, %c1, %c0_28, %c0_29], %52 {strides = array<i32>} : memref<1x4x8x8xf32, #tpu.memory_space<vmem>>, vector<1x1x8x8xf32>,
    %53 = vector.extract_strided_slice %36 {offsets = [0, 40], sizes = [8, 8], strides = [1, 1]} : vector<8x96xf32> to vector<8x8xf32>
    %c0_30 = arith.constant 0 : index
    %c1_31 = arith.constant 1 : index
    %c0_32 = arith.constant 0 : index
    %c0_33 = arith.constant 0 : index
    %54 = vector.load %arg8[%c0_30, %c1_31, %c0_32, %c0_33] : memref<1x4x8x8xf32, #tpu.memory_space<vmem>>, vector<1x1x8x8xf32>
    %55 = vector.shape_cast %54 : vector<1x1x8x8xf32> to vector<8x8xf32>
    %56 = vector.shape_cast %53 : vector<8x8xf32> to vector<1x1x8x8xf32>
    tpu.vector_store %arg8[%c0_30, %c1_31, %c0_32, %c0_33], %56 {strides = array<i32>} : memref<1x4x8x8xf32, #tpu.memory_space<vmem>>, vector<1x1x8x8xf32>,
    %57 = vector.extract_strided_slice %36 {offsets = [0, 72], sizes = [8, 8], strides = [1, 1]} : vector<8x96xf32> to vector<8x8xf32>
    %c0_34 = arith.constant 0 : index
    %c1_35 = arith.constant 1 : index
    %c0_36 = arith.constant 0 : index
    %c0_37 = arith.constant 0 : index
    %58 = vector.load %arg9[%c0_34, %c1_35, %c0_36, %c0_37] : memref<1x4x8x8xf32, #tpu.memory_space<vmem>>, vector<1x1x8x8xf32>
    %59 = vector.shape_cast %58 : vector<1x1x8x8xf32> to vector<8x8xf32>
    %60 = vector.shape_cast %57 : vector<8x8xf32> to vector<1x1x8x8xf32>
    tpu.vector_store %arg9[%c0_34, %c1_35, %c0_36, %c0_37], %60 {strides = array<i32>} : memref<1x4x8x8xf32, #tpu.memory_space<vmem>>, vector<1x1x8x8xf32>,
    %61 = vector.extract_strided_slice %36 {offsets = [0, 16], sizes = [8, 8], strides = [1, 1]} : vector<8x96xf32> to vector<8x8xf32>
    %c0_38 = arith.constant 0 : index
    %c2 = arith.constant 2 : index
    %c0_39 = arith.constant 0 : index
    %c0_40 = arith.constant 0 : index
    %62 = vector.load %arg7[%c0_38, %c2, %c0_39, %c0_40] : memref<1x4x8x8xf32, #tpu.memory_space<vmem>>, vector<1x1x8x8xf32>
    %63 = vector.shape_cast %62 : vector<1x1x8x8xf32> to vector<8x8xf32>
    %64 = vector.shape_cast %61 : vector<8x8xf32> to vector<1x1x8x8xf32>
    tpu.vector_store %arg7[%c0_38, %c2, %c0_39, %c0_40], %64 {strides = array<i32>} : memref<1x4x8x8xf32, #tpu.memory_space<vmem>>, vector<1x1x8x8xf32>,
    %65 = vector.extract_strided_slice %36 {offsets = [0, 48], sizes = [8, 8], strides = [1, 1]} : vector<8x96xf32> to vector<8x8xf32>
    %c0_41 = arith.constant 0 : index
    %c2_42 = arith.constant 2 : index
    %c0_43 = arith.constant 0 : index
    %c0_44 = arith.constant 0 : index
    %66 = vector.load %arg8[%c0_41, %c2_42, %c0_43, %c0_44] : memref<1x4x8x8xf32, #tpu.memory_space<vmem>>, vector<1x1x8x8xf32>
    %67 = vector.shape_cast %66 : vector<1x1x8x8xf32> to vector<8x8xf32>
    %68 = vector.shape_cast %65 : vector<8x8xf32> to vector<1x1x8x8xf32>
    tpu.vector_store %arg8[%c0_41, %c2_42, %c0_43, %c0_44], %68 {strides = array<i32>} : memref<1x4x8x8xf32, #tpu.memory_space<vmem>>, vector<1x1x8x8xf32>,
    %69 = vector.extract_strided_slice %36 {offsets = [0, 80], sizes = [8, 8], strides = [1, 1]} : vector<8x96xf32> to vector<8x8xf32>
    %c0_45 = arith.constant 0 : index
    %c2_46 = arith.constant 2 : index
    %c0_47 = arith.constant 0 : index
    %c0_48 = arith.constant 0 : index
    %70 = vector.load %arg9[%c0_45, %c2_46, %c0_47, %c0_48] : memref<1x4x8x8xf32, #tpu.memory_space<vmem>>, vector<1x1x8x8xf32>
    %71 = vector.shape_cast %70 : vector<1x1x8x8xf32> to vector<8x8xf32>
    %72 = vector.shape_cast %69 : vector<8x8xf32> to vector<1x1x8x8xf32>
    tpu.vector_store %arg9[%c0_45, %c2_46, %c0_47, %c0_48], %72 {strides = array<i32>} : memref<1x4x8x8xf32, #tpu.memory_space<vmem>>, vector<1x1x8x8xf32>,
    %73 = vector.extract_strided_slice %36 {offsets = [0, 24], sizes = [8, 8], strides = [1, 1]} : vector<8x96xf32> to vector<8x8xf32>
    %c0_49 = arith.constant 0 : index
    %c3 = arith.constant 3 : index
    %c0_50 = arith.constant 0 : index
    %c0_51 = arith.constant 0 : index
    %74 = vector.load %arg7[%c0_49, %c3, %c0_50, %c0_51] : memref<1x4x8x8xf32, #tpu.memory_space<vmem>>, vector<1x1x8x8xf32>
    %75 = vector.shape_cast %74 : vector<1x1x8x8xf32> to vector<8x8xf32>
    %76 = vector.shape_cast %73 : vector<8x8xf32> to vector<1x1x8x8xf32>
    tpu.vector_store %arg7[%c0_49, %c3, %c0_50, %c0_51], %76 {strides = array<i32>} : memref<1x4x8x8xf32, #tpu.memory_space<vmem>>, vector<1x1x8x8xf32>,
    %77 = vector.extract_strided_slice %36 {offsets = [0, 56], sizes = [8, 8], strides = [1, 1]} : vector<8x96xf32> to vector<8x8xf32>
    %c0_52 = arith.constant 0 : index
    %c3_53 = arith.constant 3 : index
    %c0_54 = arith.constant 0 : index
    %c0_55 = arith.constant 0 : index
    %78 = vector.load %arg8[%c0_52, %c3_53, %c0_54, %c0_55] : memref<1x4x8x8xf32, #tpu.memory_space<vmem>>, vector<1x1x8x8xf32>
    %79 = vector.shape_cast %78 : vector<1x1x8x8xf32> to vector<8x8xf32>
    %80 = vector.shape_cast %77 : vector<8x8xf32> to vector<1x1x8x8xf32>
    tpu.vector_store %arg8[%c0_52, %c3_53, %c0_54, %c0_55], %80 {strides = array<i32>} : memref<1x4x8x8xf32, #tpu.memory_space<vmem>>, vector<1x1x8x8xf32>,
    %81 = vector.extract_strided_slice %36 {offsets = [0, 88], sizes = [8, 8], strides = [1, 1]} : vector<8x96xf32> to vector<8x8xf32>
    %c0_56 = arith.constant 0 : index
    %c3_57 = arith.constant 3 : index
    %c0_58 = arith.constant 0 : index
    %c0_59 = arith.constant 0 : index
    %82 = vector.load %arg9[%c0_56, %c3_57, %c0_58, %c0_59] : memref<1x4x8x8xf32, #tpu.memory_space<vmem>>, vector<1x1x8x8xf32>
    %83 = vector.shape_cast %82 : vector<1x1x8x8xf32> to vector<8x8xf32>
    %84 = vector.shape_cast %81 : vector<8x8xf32> to vector<1x1x8x8xf32>
    tpu.vector_store %arg9[%c0_56, %c3_57, %c0_58, %c0_59], %84 {strides = array<i32>} : memref<1x4x8x8xf32, #tpu.memory_space<vmem>>, vector<1x1x8x8xf32>,
    return
  }
  func.func @transform_0(%arg0: i32, %arg1: i32) -> (i32, i32, i32) {
    %c0_i32 = arith.constant 0 : i32
    %c0_i32_0 = arith.constant 0 : i32
    return %arg0, %arg1, %c0_i32 : i32, i32, i32
  }
  func.func @transform_1(%arg0: i32, %arg1: i32) -> (i32, i32) {
    %c0_i32 = arith.constant 0 : i32
    %c0_i32_0 = arith.constant 0 : i32
    %c0_i32_1 = arith.constant 0 : i32
    return %c0_i32, %c0_i32_0 : i32, i32
  }
  func.func @transform_2(%arg0: i32, %arg1: i32) -> (i32, i32) {
    %c0_i32 = arith.constant 0 : i32
    %c0_i32_0 = arith.constant 0 : i32
    %c0_i32_1 = arith.constant 0 : i32
    return %c0_i32, %c0_i32_0 : i32, i32
  }
  func.func @transform_3(%arg0: i32, %arg1: i32) -> (i32, i32) {
    %c0_i32 = arith.constant 0 : i32
    %c0_i32_0 = arith.constant 0 : i32
    %c0_i32_1 = arith.constant 0 : i32
    return %c0_i32, %c0_i32_0 : i32, i32
  }
  func.func @transform_4(%arg0: i32, %arg1: i32) -> (i32, i32) {
    %c0_i32 = arith.constant 0 : i32
    %c0_i32_0 = arith.constant 0 : i32
    %c0_i32_1 = arith.constant 0 : i32
    return %c0_i32, %c0_i32_0 : i32, i32
  }
  func.func @transform_5(%arg0: i32, %arg1: i32) -> (i32, i32, i32, i32) {
    %c0_i32 = arith.constant 0 : i32
    %c0_i32_0 = arith.constant 0 : i32
    %c0_i32_1 = arith.constant 0 : i32
    return %arg0, %c0_i32, %arg1, %c0_i32_0 : i32, i32, i32, i32
  }
  func.func @transform_6(%arg0: i32, %arg1: i32) -> (i32, i32, i32, i32) {
    %c0_i32 = arith.constant 0 : i32
    %c0_i32_0 = arith.constant 0 : i32
    %c0_i32_1 = arith.constant 0 : i32
    return %arg0, %c0_i32, %arg1, %c0_i32_0 : i32, i32, i32, i32
  }
  func.func @transform_7(%arg0: i32, %arg1: i32) -> (i32, i32, i32, i32) {
    %c0_i32 = arith.constant 0 : i32
    %c0_i32_0 = arith.constant 0 : i32
    %c0_i32_1 = arith.constant 0 : i32
    return %arg0, %c0_i32, %arg1, %c0_i32_0 : i32, i32, i32, i32
  }
}

</mosaic_0001>

<bundles_post_ra>
// kernel: tpu_custom_call.1
= control target key start
LH: loop header
LB: loop body
LE: loop exit
PB: predicated region body
PF: predicated region fallthrough
CT: control target
= control target key end

     0   :  { %s1419_s0 = inlined_call_operand.hbm [shape: f32[2,8,32], index: 0, kind: input, shape index: {}]   ;;  %s1420_s1 = inlined_call_operand.hbm [shape: f32[1,32], index: 1, kind: input, shape index: {}]   ;;  %s1421_s2 = inlined_call_operand.vmem [shape: f32[1,32], index: 2, kind: input, shape index: {}]   ;;  %s1422_s3 = inlined_call_operand.hbm [shape: f32[32,96], index: 3, kind: input, shape index: {}]   ;;  %s1423_s4 = inlined_call_operand.vmem [shape: f32[1,96], index: 4, kind: input, shape index: {}]   ;;  %s1424_s5 = inlined_call_operand.hbm [shape: f32[2,4,8,8], index: 5, kind: output, shape index: {0}]   ;;  %s1425_s6 = inlined_call_operand.hbm [shape: f32[2,4,8,8], index: 6, kind: output, shape index: {1}]   ;;  %s1426_s7 = inlined_call_operand.hbm [shape: f32[2,4,8,8], index: 7, kind: output, shape index: {2}]  }
   0x1   :  { %1428 = sst [smem:[#allocation16_spill]] %s1419_s0 }
   0x2   :  { %1429 = sst [smem:[#allocation17_spill]] %s1420_s1 }
   0x3   :  { %1430 = sst [smem:[#allocation18_spill]] %s1421_s2 }
   0x4   :  { %1431 = sst [smem:[#allocation19_spill]] %s1422_s3 }
   0x5   :  { %13 = vsyncpa [#allocation3], 0 }
   0x6   :  { %15 = vsyncpa [#allocation3 + $0x1], 0 }
   0x7   :  { %16 = vsyncpa [#allocation6], 0 }
   0x8   :  { %17 = vsyncpa [#allocation4], 0 }
   0x9   :  { %19 = vsyncpa [#allocation4 + $0x1], 0 }
   0xa   :  { %20 = vsyncpa [#allocation10], 0 }
   0xb   :  { %22 = vsyncpa [#allocation10 + $0x1], 0  ;;  %s1178_s24 = smov 0   ;;  %s1180_s25 = smov 0  }
   0xc   :  { %s1182_s26 = smov 0   ;;  %s1184_s27 = smov 0  }
   0xd   :  { %s1186_s28 = smov 0   ;;  %s1188_s29 = smov 0  }
   0xe LB: > { %s1209_s30 = sadd.s32 4294967295, %s1118_s29   ;;  %s1427_s8 = sadd.s32 4294967294, %s1118_s29   ;;  %s1118_s29 = sphi %s1188_s29, %s28_s29   ;;  %s1114_s28 = sphi %s1186_s28, %s1445_s28   ;;  %s1110_s27 = sphi %s1184_s27, %s1444_s27   ;;  %s1106_s26 = sphi %s1182_s26, %s1443_s26   ;;  %s1102_s25 = sphi %s1180_s25, %s1442_s25   ;;  %s1098_s24 = sphi %s1178_s24, %s1441_s24  }
   0xf   : > { %p62_p0 = scmp.ne.s32.totalorder %s1102_s25, %s1098_s24  ;;  %p63_p1 = scmp.eq.s32.totalorder %s1209_s30, 0 }
  0x10   : > { %p178_p2 = scmp.eq.s32.totalorder %s1427_s8, 1  ;;  %p729_p4 = scmp.ge.s32.totalorder %s1118_s29, 1 }
  0x11   : > { %p1219_p3 = por %p63_p1, %p62_p0  ;;  %p241_p6 = scmp.lt.s32.totalorder %s1118_s29, 3 }
  0x12   : > { %p1224_p5 = por %p178_p2, %p62_p0  ;;  %s1434_s1 = sld [smem:[#allocation17_spill]] }
  0x13   : > { %p1232_p7 = pnand %p729_p4, %p241_p6  ;;  %p732_p8 = scmp.ge.s32.totalorder %s1118_s29, 2 }
  0x14   : > { %s1120_s15 = smov [#allocation5]   ;;  %s1436_s3 = sld [smem:[#allocation19_spill]] }
  0x15   : > { %p782_p9 = pneg %p1232_p7  ;;  %s255_s16 = sshll.u32 %s1120_s15, 4  ;;  %s256_s16 = int_to_ptr.vmem [resolvable:$true] %s255_s16 }
  0x16   : > { %s1121_s20 = smov [#allocation7]   ;;  %s1122_s22 = smov 128  }
  0x17   : > { %p783_p10 = pnand %p782_p9, %p63_p1  ;;  %s269_s21 = sshll.u32 %s1121_s20, 4  ;;  %s270_s21 = int_to_ptr.vmem [resolvable:$true] %s269_s21 }
  0x18   : > { %s253_s13 = sshll.u32 %s1434_s1, 4  ;;  %s1123_s23 = smov 8   ;;  %s254_s13 = int_to_ptr.hbm [resolvable:$true] %s253_s13 }
  0x19   : > { %785 = dma.hbm_to_vmem [thread:$0]  (!%p783_p10), %s254_s13, 16, %s256_s16, [#allocation6]  }
  0x1a   : > { %s267_s19 = sshll.u32 %s1436_s3, 4  ;;  %p172_p11 = scmp.eq.s32.totalorder %s1209_s30, 1  ;;  %s268_s19 = int_to_ptr.hbm [resolvable:$true] %s267_s19 }
  0x1b   : > { %788 = dma.hbm_to_vmem [thread:$0]  (!%p783_p10), %s268_s19, 512, %s270_s21, [#allocation6], %s1122_s22, %s1122_s22, %s1123_s23  }
  0x1c   : > { %s40_s11 = sadd.s32 1, %s1114_s28  ;;  %s49_s12 = sadd.s32 1, %s1106_s26 }
  0x1d   : > { %p42_p12 = scmp.ge.s32.totalorder %s40_s11, 2  ;;  %p56_p13 = scmp.ne.s32.totalorder %s1106_s26, %s1102_s25 }
  0x1e   : > { %p57_p0 = scmp.eq.s32.totalorder %s1118_s29, 0  ;;  %p805_p4 = scmp.lt.s32.totalorder %s1118_s29, 2 }
  0x1f   : > { %s1447_s11 = smov (%p42_p12, %s40_s11), 0  ;;  %p1252_p2 = por %p172_p11, %p56_p13 }
  0x20   : > { %s44_s13 = ssub.s32 %s1114_s28, %s1447_s11  ;;  %s286_s16 = sand.u32 1, %s1106_s26  }
  0x21   : > { %p47_p6 = scmp.eq.s32.totalorder %s44_s13, 0  ;;  %p58_p9 = por %p57_p0, %p56_p13 }
  0x22   : > { %s733_s17 = sshll.u32 %s286_s16, 3  ;;  %s734_s18 = sshll.u32 %s1114_s28, 3 }
  0x23   : > { %s1262_s19 = scalar_select %p47_p6, %s1106_s26, %s49_s12  }
  0x24   : > { %s1438_s0 = sld [smem:[#allocation16_spill]]  ;;  %s290_s8 = scalar_lea.vmem [#allocation2], %s733_s17 }
  0x25   : > { %s299_s1 = sshll.u32 %s290_s8, 4  ;;  %p790_p10 = pnand %p805_p4, %p58_p9  ;;  %s300_s1 = int_to_ptr.vmem [resolvable:$true] %s299_s1 }
  0x26   : > { %s287_s3 = scalar_lea.sflag [#allocation3], %s286_s16  ;;  %s1272_s12 = sand.u32 (!%p1232_p7), 1, %s1102_s25  }
  0x27   : > { %s736_s13 = sshll.u32 (!%p1232_p7), %s1272_s12, 3 }
  0x28   : > { %308 = sbr.rel (%p1232_p7) target bundleno = 604 (0x25c), region = 40  ;;  %s314_s20 = scalar_lea.vmem (!%p1232_p7), [#allocation2], %s736_s13 }
  0x2a   : > { %s295_s22 = scalar_lea.hbm %s1438_s0, %s734_s18  ;;  %s311_s18 = scalar_lea.sflag (!%p1232_p7), [#allocation3], %s1272_s12 }
  0x2b   : > { %s297_s23 = sshll.u32 %s295_s22, 4  ;;  %s298_s23 = int_to_ptr.hbm [resolvable:$true] %s297_s23 }
  0x2c   : > { %792 = dma.hbm_to_vmem [thread:$0]  (!%p790_p10), %s298_s23, 128, %s300_s1, %s287_s3  }
  0x2d   : > { %1081 = dma.done.wait (%p1219_p3), %s311_s18, 128  }
  0x2e   : > { %1083 = vsyncadd (%p1219_p3), %s311_s18, 4294967168 }
  0x2f   : > { %1085 = dma.done.wait (%p63_p1), [#allocation6], 528  }
  0x30   : > { %1087 = vsyncadd (%p63_p1), [#allocation6], 4294966768  ;;  %vm369_vm0 = vcmask 261120   ;;  %v366_v0 = vld [vmem:[%s314_s20] sm:$0xff]  ;;  %v1124_v2 = vmov 32.0   ;;  %v407_v17 = vld [vmem:[#allocation7] sm:$0xff] }
  0x31   : > { %v370_v1 = vsel %vm369_vm0, %v366_v0, 0.0  ;;  %878 = vrcp.f32 %v1124_v2  ;;  %v410_v14 = vld [vmem:[#allocation7 + $0x18] sm:$0xff]  ;;  %v409_v15 = vld [vmem:[#allocation7 + $0x10] sm:$0xff]  ;;  %v408_v16 = vld [vmem:[#allocation7 + $0x8] sm:$0xff]  ;;  %s1439_s2 = sld [smem:[#allocation18_spill]]  ;;  %s1294_s14 = sshll.u32 %s1272_s12, 5 }
  0x32   : > { %371 = vadd.xlane.f32.xlu0 %v370_v1  ;;  %430 = vmatpush.msra.mxu0 %v410_v14  ;;  %v875_v27 = vld [vmem:[#allocation5] ss:$0 sm:$0xff]  ;;  %v877_v33 = vld [vmem:[%s1423_s4] ss:$0 sm:$0xff]  ;;  %vm438_vm5 = vcmask 64512   ;;  %s1125_s16 = smov 64  }
  0x33   : > { %s1126_s17 = smov 80   ;;  %s1297_s21 = scalar_lea.vmem [#allocation8], %s1294_s14 }
  0x34   : > { %431 = vmatpush.msra.mxu0 %v409_v15  ;;  %s1127_s22 = smov 96   ;;  %s1128_s23 = smov 72  }
  0x35   : > { %s1129_s13 = smov 88   ;;  %s1130_s18 = smov 56  }
  0x36   : > { %432 = vmatpush.msra.mxu0 %v408_v16  ;;  %s1131_s20 = smov 120   ;;  %s1132_s1 = smov 48  }
  0x37   : > { %v879_v3 = vpop.eup %878  ;;  %v876_v30 = vld [vmem:[%s1439_s2] ss:$0 sm:$0xff]  ;;  %s1133_s3 = smov 112   ;;  %s1134_s8 = smov 40  }
  0x38   : > { %v374_v4 = vmul.f32 32.0, %v879_v3  ;;  %vm378_vm1 = vweird.f32 %v879_v3  ;;  %433 = vmatpush.msra.mxu0 %v407_v17  ;;  %s1135_s9 = smov 104  }
  0x3a   : > { %v375_v5 = vsub.f32 1.0, %v374_v4 }
  0x3c   : > { %v376_v6 = vmul.f32 %v879_v3, %v375_v5 }
  0x3e   : > { %v377_v7 = vadd.f32 %v879_v3, %v376_v6 }
  0x40   : > { %v379_v8 = vsel %vm378_vm1, %v879_v3, %v377_v7 }
  0xa5   : > { %v372_v9 = vpop.xlane.xlu0 %371 }
  0xa6   : > { %v380_v10 = vmul.f32 %v379_v8, %v372_v9 }
  0xa8   : > { %v381_v11 = vsub.f32 %v366_v0, %v380_v10 }
  0xaa   : > { %v382_v12 = vmul.f32 %v381_v11, %v381_v11 }
  0xac   : > { %v383_v13 = vsel %vm369_vm0, %v382_v12, 0.0 }
  0xad   : > { %384 = vadd.xlane.f32.xlu0 %v383_v13 }
 0x120   : > { %v385_v18 = vpop.xlane.xlu0 %384 }
 0x121   : > { %v386_v19 = vmul.f32 %v385_v18, %v379_v8 }
 0x123   : > { %v387_v20 = vadd.f32 1e-05, %v386_v19 }
 0x125   : > { %880 = vrsqrt.f32 %v387_v20  ;;  %vm394_vm3 = vweird.f32 %v387_v20 }
 0x12b   : > { %v881_v21 = vpop.eup %880 }
 0x12c   : > { %v389_v22 = vmul.f32 %v881_v21, %v387_v20  ;;  %vm395_vm2 = vweird.f32 %v881_v21 }
 0x12d   : > { %vm396_vm4 = vmor %vm394_vm3, %vm395_vm2 }
 0x12e   : > { %v390_v23 = vmul.f32 %v881_v21, %v389_v22 }
 0x130   : > { %v391_v24 = vmul.f32 0.5, %v390_v23 }
 0x132   : > { %v392_v25 = vsub.f32 1.5, %v391_v24 }
 0x134   : > { %v393_v26 = vmul.f32 %v881_v21, %v392_v25 }
 0x136   : > { %v397_v28 = vsel %vm396_vm4, %v881_v21, %v393_v26 }
 0x137   : > { %v398_v29 = vmul.f32 %v397_v28, %v381_v11 }
 0x139   : > { %v402_v31 = vmul.f32 %v875_v27, %v398_v29 }
 0x13b   : > { %v406_v32 = vadd.f32 %v876_v30, %v402_v31 }
 0x13d   : > { %742 = vmatmul.msk.f32.vlgmr.msra.gmra.mxu0 %vm369_vm0, %v406_v32 }
 0x1ba   : > { %v435_v34 = vpop.f32.mrf.mxu0 }
 0x1bb   : > { %v436_v35 = vadd.f32 %v877_v33, %v435_v34 }
 0x1bd   : > { %445 = vrot.lane.b32.xlu0 %v436_v35, %s1125_s16  ;;  %469 = vrot.lane.b32.xlu2 %v436_v35, %s1126_s17  ;;  %439 = vst.msk [vmem:[%s1297_s21] sm:$0xff] %vm438_vm5, %v436_v35  ;;  %s358_s16 = scalar_lea.vmem [#allocation9], %s1294_s14  ;;  %s365_s17 = scalar_lea.vmem [#allocation11], %s1294_s14 }
 0x1be   : > { %441 = vrot.lane.b32.xlu1 %v436_v35, %s1127_s22  ;;  %s1307_s22 = sshll.u32 %s1110_s27, 5 }
 0x1bf   : > { %s553_s27 = scalar_lea.hbm %s1426_s7, %s1307_s22 }
 0x1c0   : > { %s1325_s0 = sshll.u32 %s553_s27, 4  ;;  %s557_s0 = int_to_ptr.hbm [resolvable:$true] %s1325_s0 }
 0x1c5   : > { %484 = vrot.lane.b32.xlu2 %v436_v35, %s1128_s23  ;;  %s536_s23 = sshll.u32 %s358_s16, 4  ;;  %s1321_s23 = int_to_ptr.vmem [resolvable:$true] %s536_s23 }
 0x1c6   : > { %454 = vrot.lane.b32.xlu1 %v436_v35, %s1129_s13 }
 0x1cd   : > { %459 = vrot.lane.b32.xlu2 %v436_v35, %s1130_s18 }
 0x1ce   : > { %449 = vrot.lane.b32.xlu1 %v436_v35, %s1131_s20  ;;  %s535_s20 = scalar_lea.hbm %s1425_s6, %s1307_s22 }
 0x1d5   : > { %474 = vrot.lane.b32.xlu2 %v436_v35, %s1132_s1  ;;  %s992_s1 = scalar_lea.hbm %s1425_s6, 64 }
 0x1d6   : > { %464 = vrot.lane.b32.xlu1 %v436_v35, %s1133_s3  ;;  %s499_s3 = sand.u32 1, %s1209_s30  }
 0x1d7   : > { %s1333_s30 = scalar_lea.sflag [#allocation10], %s499_s3 }
 0x1dd   : > { %489 = vrot.lane.b32.xlu2 %v436_v35, %s1134_s8  ;;  %s1323_s8 = sshll.u32 %s535_s20, 4  ;;  %s539_s8 = int_to_ptr.hbm [resolvable:$true] %s1323_s8 }
 0x1de   : > { %479 = vrot.lane.b32.xlu1 %v436_v35, %s1135_s9  ;;  %s554_s9 = sshll.u32 %s365_s17, 4  ;;  %s986_s13 = sshra.s32 %s539_s8, 4  ;;  %s1328_s9 = int_to_ptr.vmem [resolvable:$true] %s554_s9  ;;  %s987_s13 = int_to_ptr.hbm [resolvable:$true] %s986_s13 }
 0x1df   : > { %s988_s18 = scalar_lea.hbm %s987_s13, 32  ;;  %p993_p11 = scmp.lt.s32.totalorder %s987_s13, %s1425_s6 }
 0x1e0   : > { %p989_p1 = scmp.ne.s32.totalorder %s987_s13, %s988_s18  ;;  %p994_p12 = scmp.lt.s32.totalorder %s992_s1, %s988_s18 }
 0x1e2   : > { %p990_p3 = pnand %p989_p1, %p1252_p2  ;;  %p995_p13 = por %p994_p12, %p993_p11 }
 0x1e4   : > { %p991_p7 = pneg %p990_p3 }
 0x1e6   : > { %p996_p0 = pnand %p995_p13, %p991_p7 }
 0x217   : > { %v470_v36 = vpop.permute.xlu2 %469 }
 0x218   : > { %747 = vst.msk [vmem:[%s358_s16 + $0x10] sm:$0xff] %vm438_vm5, %v470_v36 }
 0x21f   : > { %v485_v37 = vpop.permute.xlu2 %484 }
 0x220   : > { %750 = vst.msk [vmem:[%s358_s16 + $0x18] sm:$0xff] %vm438_vm5, %v485_v37 }
 0x227   : > { %v460_v38 = vpop.permute.xlu2 %459 }
 0x228   : > { %745 = vst.msk [vmem:[%s365_s17 + $0x8] sm:$0xff] %vm438_vm5, %v460_v38 }
 0x22f   : > { %v446_v39 = vpop.permute.xlu0 %445  ;;  %v475_v40 = vpop.permute.xlu2 %474 }
 0x230   : > { %448 = vst.msk [vmem:[%s365_s17] sm:$0xff] %vm438_vm5, %v446_v39  ;;  %v442_v41 = vpop.permute.xlu1 %441 }
 0x231   : > { %748 = vst.msk [vmem:[%s365_s17 + $0x10] sm:$0xff] %vm438_vm5, %v475_v40 }
 0x232   : > { %444 = vst.msk [vmem:[%s358_s16] sm:$0xff] %vm438_vm5, %v442_v41 }
 0x237   : > { %v490_v42 = vpop.permute.xlu2 %489 }
 0x238   : > { %751 = vst.msk [vmem:[%s365_s17 + $0x18] sm:$0xff] %vm438_vm5, %v490_v42  ;;  %v455_v43 = vpop.permute.xlu1 %454 }
 0x239   : > { %744 = vst.msk [vmem:[%s358_s16 + $0x8] sm:$0xff] %vm438_vm5, %v455_v43 }
 0x23a   : > { %999 = shalt.err (!%p996_p0)
}
 0x23b   : > { %s1136_s16 = smov 128   ;;  %s1137_s17 = smov 8  }
 0x23c   : > { %777 = dma.vmem_to_hbm [thread:$0]  (%p1252_p2), %s1321_s23, 512, %s539_s8, %s1333_s30, %s1136_s16, %s1136_s16, %s1137_s17  }
 0x23d   : > { %s1014_s3 = sshra.s32 %s557_s0, 4  ;;  %s1020_s20 = scalar_lea.hbm %s1426_s7, 64  ;;  %s1015_s3 = int_to_ptr.hbm [resolvable:$true] %s1014_s3 }
 0x23e   : > { %s1016_s2 = scalar_lea.hbm %s1015_s3, 32  ;;  %p1021_p10 = scmp.lt.s32.totalorder %s1015_s3, %s1426_s7 }
 0x23f   : > { %p1017_p4 = scmp.ne.s32.totalorder %s1015_s3, %s1016_s2  ;;  %p1022_p1 = scmp.lt.s32.totalorder %s1020_s20, %s1016_s2 }
 0x241   : > { %p1018_p6 = pnand %p1017_p4, %p1252_p2  ;;  %p1023_p3 = por %p1022_p1, %p1021_p10 }
 0x243   : > { %p1019_p9 = pneg %p1018_p6 }
 0x245   : > { %p1024_p7 = pnand %p1023_p3, %p1019_p9 }
 0x247   : > { %1027 = shalt.err (!%p1024_p7)
}
 0x248   : > { %778 = dma.vmem_to_hbm [thread:$0]  (%p1252_p2), %s1328_s9, 512, %s557_s0, %s1333_s30, %s1136_s16, %s1136_s16, %s1137_s17   ;;  %v450_v44 = vpop.permute.xlu1 %449 }
 0x249   : > { %743 = vst.msk [vmem:[%s1297_s21 + $0x8] sm:$0xff] %vm438_vm5, %v450_v44  ;;  %s517_s27 = scalar_lea.hbm %s1424_s5, %s1307_s22  ;;  %s518_s3 = sshll.u32 %s1297_s21, 4  ;;  %s519_s3 = int_to_ptr.vmem [resolvable:$true] %s518_s3 }
 0x24a   : > { %s520_s2 = sshll.u32 %s517_s27, 4  ;;  %s495_s13 = scalar_lea.sflag [#allocation4], %s1272_s12  ;;  %s521_s2 = int_to_ptr.hbm [resolvable:$true] %s520_s2 }
 0x24b   : > { %s1042_s0 = sshra.s32 %s521_s2, 4  ;;  %s1048_s20 = scalar_lea.hbm %s1424_s5, 64  ;;  %s1043_s0 = int_to_ptr.hbm [resolvable:$true] %s1042_s0 }
 0x24c   : > { %s1044_s9 = scalar_lea.hbm %s1043_s0, 32  ;;  %p1049_p0 = scmp.lt.s32.totalorder %s1043_s0, %s1424_s5 }
 0x24d   : > { %p1045_p11 = scmp.ne.s32.totalorder %s1043_s0, %s1044_s9  ;;  %p1050_p4 = scmp.lt.s32.totalorder %s1048_s20, %s1044_s9 }
 0x24f   : > { %p1046_p12 = pnand %p1045_p11, %p1252_p2  ;;  %p1051_p6 = por %p1050_p4, %p1049_p0 }
 0x250   : > { %v465_v45 = vpop.permute.xlu1 %464 }
 0x251   : > { %746 = vst.msk [vmem:[%s1297_s21 + $0x10] sm:$0xff] %vm438_vm5, %v465_v45  ;;  %p1047_p13 = pneg %p1046_p12 }
 0x253   : > { %p1052_p9 = pnand %p1051_p6, %p1047_p13 }
 0x258   : > { %v480_v46 = vpop.permute.xlu1 %479 }
 0x259   : > { %749 = vst.msk [vmem:[%s1297_s21 + $0x18] sm:$0xff] %vm438_vm5, %v480_v46 }
 0x25a   : > { %1055 = shalt.err (!%p1052_p9)
}
 0x25b   : > { %776 = dma.vmem_to_hbm [thread:$0]  (%p1252_p2), %s519_s3, 512, %s521_s2, %s495_s13, %s1136_s16, %s1136_s16, %s1137_s17  }
 0x25c PF: > { %s571_s12 = sand.u32 1, %s1098_s24   ;;  %p794_p10 = pnand %p732_p8, %p1224_p5 }
 0x25d   : > { %s572_s21 = scalar_lea.sflag [#allocation4], %s571_s12 }
 0x25e   : > { %p795_p1 = pneg %p794_p10 }
 0x260   : > { %1089 = dma.done.wait (%p795_p1), %s572_s21, 512  }
 0x261   : > { %1091 = vsyncadd (%p795_p1), %s572_s21, 4294966784  ;;  %s1440_s1 = sadd.s32 4294967294, %s1118_s29  }
 0x262   : > { %s581_s23 = sand.u32 1, %s1440_s1  }
 0x263   : > { %s582_s15 = scalar_lea.sflag [#allocation10], %s581_s23 }
 0x264   : > { %1093 = dma.done.wait (%p795_p1), %s582_s15, 1024  }
 0x265   : > { %1095 = vsyncadd (%p795_p1), %s582_s15, 4294966272  ;;  %s28_s29 = sadd.s32 1, %s1118_s29   ;;  %s1441_s24 = smov %s1102_s25 }
 0x266   : > { %p25_p2 = scmp.ge.s32.totalorder %s28_s29, 4   ;;  %s1442_s25 = smov %s1106_s26 }
 0x267   : > { %s1443_s26 = smov %s1262_s19  ;;  %s1444_s27 = smov %s1114_s28 }
 0x268   : > { %s1445_s28 = smov %s1447_s11  ;;  %27 = sbr.rel (!%p25_p2) target bundleno = 14 (0xe), region = 134 }
 0x26d   :  { %598 = vsyncpa [#allocation3], 1 }
 0x26e   :  { %600 = vsyncpa [#allocation3 + $0x1], 1 }
 0x26f   :  { %601 = vsyncpa [#allocation6], 1 }
 0x270   :  { %602 = vsyncpa [#allocation4], 1 }
 0x271   :  { %604 = vsyncpa [#allocation4 + $0x1], 1 }
 0x272   :  { %605 = vsyncpa [#allocation10], 1 }
 0x273   :  { %607 = vsyncpa [#allocation10 + $0x1], 1 }

</bundles_post_ra>
